<compile_context>
chip_gen: v6e
topology: v6e:2x2x1
jax: 0.10.0
libtpu: 0.0.40
codegen_flags: <defaults>
</compile_context>

<pallas_src>
import jax
import jax.numpy as jnp
from jax import lax
from jax.experimental import pallas as pl
from jax.experimental.pallas import tpu as pltpu


def _round_up(a, b):
    return (a + b - 1) // b * b


def _vmem_budget():
    """Per-generation tile budget / scoped-VMEM limit (bytes)."""
    cap = None
    try:
        info = pltpu.get_tpu_info()
        cap = getattr(info, "vmem_capacity_bytes", None)
    except Exception:
        cap = None
    if not cap:
        cap = 64 * 1024 * 1024            # conservative fallback (v7x per-TC VMEM)
    tile_budget = min(int(cap * 0.60), 100 * 1024 * 1024)
    vmem_limit = min(int(cap * 0.75), 112 * 1024 * 1024)
    return tile_budget, vmem_limit


def _conv_stats_kernel(patches_ref, w_ref, conv_ref, psum_ref, psumsq_ref):
    # bf16 x bf16 -> f32 on the MXU; conv is written to HBM exactly once.
    conv = jnp.dot(patches_ref[...], w_ref[...], preferred_element_type=jnp.float32)
    conv_ref[...] = conv
    # Per-tile partial BN statistics (row 0 of an aligned (8, C_pad) block).
    psum_ref[...] = jnp.zeros_like(psum_ref)
    psumsq_ref[...] = jnp.zeros_like(psumsq_ref)
    psum_ref[0:1, :] = jnp.sum(conv, axis=0, keepdims=True)
    psumsq_ref[0:1, :] = jnp.sum(conv * conv, axis=0, keepdims=True)


def _bn_relu_kernel(conv_ref, scale_ref, shift_ref, o_ref):
    # Fused BN (scale/shift) + ReLU, in place on the conv buffer (aliased).
    o_ref[...] = jnp.maximum(conv_ref[...] * scale_ref[...] + shift_ref[...], 0.0)


def double_conv4_1(x, w, b, gamma, beta):
    """x: (N, C_in, H, W) f32; w: (C_out, C_in, 3, 3); b/gamma/beta: (C_out,).

    The conv bias `b` cancels exactly under training-mode BatchNorm (its
    per-channel mean is subtracted), so it is accepted for API parity but unused.
    """
    del b
    N, C_in, H, W = x.shape
    C_out = w.shape[0]
    Ho = (H + 2 - 3) // 2 + 1
    Wo = (W + 2 - 3) // 2 + 1

    M = N * Ho * Wo
    K = 9 * C_in
    K_pad = _round_up(K, 128)           # lane-dense MXU K feed
    C_pad = _round_up(C_out, 128)       # lane-dense output

    # ---- VMEM-budgeted tile sizing (re-derived per generation) ----
    tile_budget, vmem_limit = _vmem_budget()
    fixed = 2 * K_pad * C_pad * 2 + 4 * 8 * C_pad * 4          # weights (bf16, x2) + partials
    per_row = max(4 * K_pad + 8 * C_pad,                        # kernel A: patches bf16 x2 + conv f32 x2
                  16 * C_pad)                                   # kernel B: conv in x2 + out x2 (f32)
    tm_budget = max(256, (tile_budget - fixed) // per_row)
    tm = min(tm_budget, 8192, _round_up(M, 256))
    tm = max(256, (tm // 256) * 256)
    num_tiles = pl.cdiv(M, tm)
    M_pad = num_tiles * tm

    # ---- im2col glue: channels-last, built directly in bf16, K-pad folded in ----
    x_nhwc = jnp.transpose(x, (0, 2, 3, 1)).astype(jnp.bfloat16)     # (N, H, W, C)
    xp = jnp.pad(x_nhwc, ((0, 0), (1, 1), (1, 1), (0, 0)))
    cols = []
    for kh in range(3):
        for kw in range(3):
            cols.append(lax.slice(
                xp, (0, kh, kw, 0),
                (N, kh + 2 * (Ho - 1) + 1, kw + 2 * (Wo - 1) + 1, C_in),
                (1, 2, 2, 1)))                                       # (N, Ho, Wo, C_in)
    if K_pad > K:
        cols.append(jnp.zeros((N, Ho, Wo, K_pad - K), jnp.bfloat16))
    patches = jnp.concatenate(cols, axis=-1).reshape(M, K_pad)
    if M_pad > M:
        patches = jnp.pad(patches, ((0, M_pad - M), (0, 0)))

    # weight matching the (kh, kw, c_in) ordering of K, bf16, zero-padded
    wmat = jnp.transpose(w, (2, 3, 1, 0)).reshape(K, C_out)
    wmat = jnp.pad(wmat, ((0, K_pad - K), (0, C_pad - C_out))).astype(jnp.bfloat16)

    gamma_p = jnp.pad(gamma.astype(jnp.float32), (0, C_pad - C_out))
    beta_p = jnp.pad(beta.astype(jnp.float32), (0, C_pad - C_out))

    cparams = pltpu.CompilerParams(
        dimension_semantics=("parallel",),
        vmem_limit_bytes=vmem_limit,
    )

    # ---- kernel A: conv GEMM + per-tile partial BN statistics ----
    conv_flat, psum, psumsq = pl.pallas_call(
        _conv_stats_kernel,
        out_shape=(
            jax.ShapeDtypeStruct((M_pad, C_pad), jnp.float32),
            jax.ShapeDtypeStruct((num_tiles * 8, C_pad), jnp.float32),
            jax.ShapeDtypeStruct((num_tiles * 8, C_pad), jnp.float32),
        ),
        grid=(num_tiles,),
        in_specs=[
            pl.BlockSpec((tm, K_pad), lambda i: (i, 0)),
            pl.BlockSpec((K_pad, C_pad), lambda i: (0, 0)),
        ],
        out_specs=(
            pl.BlockSpec((tm, C_pad), lambda i: (i, 0)),
            pl.BlockSpec((8, C_pad), lambda i: (i, 0)),
            pl.BlockSpec((8, C_pad), lambda i: (i, 0)),
        ),
        compiler_params=cparams,
    )(patches, wmat)

    # ---- tiny XLA fold: batch stats -> fused per-channel scale / shift ----
    inv_m = 1.0 / float(M)                       # padded rows are zero -> divide by true M
    mean = jnp.sum(psum, axis=0) * inv_m
    var = jnp.maximum(jnp.sum(psumsq, axis=0) * inv_m - mean * mean, 0.0)
    scale = gamma_p * lax.rsqrt(var + 1e-5)
    shift = beta_p - mean * scale
    scale = scale.reshape(1, C_pad)
    shift = shift.reshape(1, C_pad)

    # ---- kernel B: in-place fused scale/shift + ReLU ----
    out_flat = pl.pallas_call(
        _bn_relu_kernel,
        out_shape=jax.ShapeDtypeStruct((M_pad, C_pad), jnp.float32),
        grid=(num_tiles,),
        in_specs=[
            pl.BlockSpec((tm, C_pad), lambda i: (i, 0)),
            pl.BlockSpec((1, C_pad), lambda i: (0, 0)),
            pl.BlockSpec((1, C_pad), lambda i: (0, 0)),
        ],
        out_specs=pl.BlockSpec((tm, C_pad), lambda i: (i, 0)),
        input_output_aliases={0: 0},
        compiler_params=cparams,
    )(conv_flat, scale, shift)

    out = out_flat[:M, :C_out].reshape(N, Ho, Wo, C_out)
    return jnp.transpose(out, (0, 3, 1, 2))      # module output is NCHW


def _reference(x, w, b, gamma, beta):
    conv = lax.conv_general_dilated(
        x, w, window_strides=(2, 2), padding=((1, 1), (1, 1)),
        dimension_numbers=("NCHW", "OIHW", "NCHW"),
    ) + b.reshape(1, -1, 1, 1)
    mean = conv.mean(axis=(0, 2, 3), keepdims=True)
    var = conv.var(axis=(0, 2, 3), keepdims=True)   # biased var, BN training forward
    y = gamma.reshape(1, -1, 1, 1) * (conv - mean) / jnp.sqrt(var + 1e-5) \
        + beta.reshape(1, -1, 1, 1)
    return jnp.maximum(y, 0.0)


if __name__ == "__main__":
    key = jax.random.PRNGKey(0)
    k_x, k_w, k_b, k_g, k_be = jax.random.split(key, 5)

    N, C_in, H, W = 2, 4, 16, 16
    C_out = 8

    x = jax.random.normal(k_x, (N, C_in, H, W), dtype=jnp.float32)
    w = 0.1 * jax.random.normal(k_w, (C_out, C_in, 3, 3), dtype=jnp.float32)
    b = 0.1 * jax.random.normal(k_b, (C_out,), dtype=jnp.float32)
    gamma = 1.0 + 0.1 * jax.random.normal(k_g, (C_out,), dtype=jnp.float32)
    beta = 0.1 * jax.random.normal(k_be, (C_out,), dtype=jnp.float32)

    fn = jax.jit(double_conv4_1)
    out = jax.block_until_ready(fn(x, w, b, gamma, beta))

    ref = _reference(x, w, b, gamma, beta)
    assert out.shape == (N, C_out, H // 2, W // 2), out.shape
    # Tolerance reflects bf16 MXU inputs (f32 accumulation / BN math); BN output is O(1).
    assert jnp.allclose(out, ref, atol=3e-2, rtol=3e-2), float(jnp.max(jnp.abs(out - ref)))

    print("KERNEL_OK")
</pallas_src>

<mosaic_0001>
module attributes {stable_mosaic.version = 11 : i64} {
  func.func @_bn_relu_kernel(%arg0: i32, %arg1: memref<256x128xf32, #tpu.memory_space<vmem>>, %arg2: memref<1x128xf32, #tpu.memory_space<vmem>>, %arg3: memref<1x128xf32, #tpu.memory_space<vmem>>, %arg4: memref<256x128xf32, #tpu.memory_space<vmem>>) attributes {dimension_semantics = [#tpu.dimension_semantics<parallel>], iteration_bounds = array<i64: 1>, scalar_prefetch = 0 : i64, scratch_operands = 0 : i64, tpu.core_type = #tpu.core_type<tc>, window_params = [{transform_indices = @transform_0, window_bounds = array<i64: 256, 128>}, {pipeline_mode = #tpu.pipeline_mode<synchronous>, transform_indices = @transform_1, window_bounds = array<i64: 1, 128>}, {pipeline_mode = #tpu.pipeline_mode<synchronous>, transform_indices = @transform_2, window_bounds = array<i64: 1, 128>}, {transform_indices = @transform_3, window_bounds = array<i64: 256, 128>}]} {
    %c0 = arith.constant 0 : index
    %c0_0 = arith.constant 0 : index
    %0 = vector.load %arg1[%c0, %c0_0] : memref<256x128xf32, #tpu.memory_space<vmem>>, vector<256x128xf32>
    %c0_1 = arith.constant 0 : index
    %c0_2 = arith.constant 0 : index
    %1 = vector.load %arg2[%c0_1, %c0_2] : memref<1x128xf32, #tpu.memory_space<vmem>>, vector<1x128xf32>
    %2 = vector.broadcast %1 : vector<1x128xf32> to vector<256x128xf32>
    %3 = arith.mulf %0, %2 : vector<256x128xf32>
    %c0_3 = arith.constant 0 : index
    %c0_4 = arith.constant 0 : index
    %4 = vector.load %arg3[%c0_3, %c0_4] : memref<1x128xf32, #tpu.memory_space<vmem>>, vector<1x128xf32>
    %5 = vector.broadcast %4 : vector<1x128xf32> to vector<256x128xf32>
    %6 = arith.addf %3, %5 : vector<256x128xf32>
    %cst = arith.constant 0.000000e+00 : f32
    %7 = vector.broadcast %cst : f32 to vector<256x128xf32>
    %8 = arith.maximumf %6, %7 : vector<256x128xf32>
    %c0_5 = arith.constant 0 : index
    %c0_6 = arith.constant 0 : index
    %9 = vector.load %arg4[%c0_5, %c0_6] : memref<256x128xf32, #tpu.memory_space<vmem>>, vector<256x128xf32>
    tpu.vector_store %arg4[%c0_5, %c0_6], %8 {strides = array<i32>} : memref<256x128xf32, #tpu.memory_space<vmem>>, vector<256x128xf32>,
    return
  }
  func.func @transform_0(%arg0: i32) -> (i32, i32) {
    %c0_i32 = arith.constant 0 : i32
    %c0_i32_0 = arith.constant 0 : i32
    return %arg0, %c0_i32 : i32, i32
  }
  func.func @transform_1(%arg0: i32) -> (i32, i32) {
    %c0_i32 = arith.constant 0 : i32
    %c0_i32_0 = arith.constant 0 : i32
    %c0_i32_1 = arith.constant 0 : i32
    return %c0_i32, %c0_i32_0 : i32, i32
  }
  func.func @transform_2(%arg0: i32) -> (i32, i32) {
    %c0_i32 = arith.constant 0 : i32
    %c0_i32_0 = arith.constant 0 : i32
    %c0_i32_1 = arith.constant 0 : i32
    return %c0_i32, %c0_i32_0 : i32, i32
  }
  func.func @transform_3(%arg0: i32) -> (i32, i32) {
    %c0_i32 = arith.constant 0 : i32
    %c0_i32_0 = arith.constant 0 : i32
    return %arg0, %c0_i32 : i32, i32
  }
}

module attributes {stable_mosaic.version = 11 : i64} {
  func.func @_conv_stats_kernel(%arg0: i32, %arg1: memref<256x128xbf16, #tpu.memory_space<vmem>>, %arg2: memref<128x128xbf16, #tpu.memory_space<vmem>>, %arg3: memref<256x128xf32, #tpu.memory_space<vmem>>, %arg4: memref<8x128xf32, #tpu.memory_space<vmem>>, %arg5: memref<8x128xf32, #tpu.memory_space<vmem>>) attributes {dimension_semantics = [#tpu.dimension_semantics<parallel>], iteration_bounds = array<i64: 1>, scalar_prefetch = 0 : i64, scratch_operands = 0 : i64, tpu.core_type = #tpu.core_type<tc>, window_params = [{transform_indices = @transform_0, window_bounds = array<i64: 256, 128>}, {pipeline_mode = #tpu.pipeline_mode<synchronous>, transform_indices = @transform_1, window_bounds = array<i64: 128, 128>}, {transform_indices = @transform_2, window_bounds = array<i64: 256, 128>}, {transform_indices = @transform_3, window_bounds = array<i64: 8, 128>}, {transform_indices = @transform_4, window_bounds = array<i64: 8, 128>}]} {
    %c0 = arith.constant 0 : index
    %c0_0 = arith.constant 0 : index
    %0 = vector.load %arg1[%c0, %c0_0] : memref<256x128xbf16, #tpu.memory_space<vmem>>, vector<256x128xbf16>
    %c0_1 = arith.constant 0 : index
    %c0_2 = arith.constant 0 : index
    %1 = vector.load %arg2[%c0_1, %c0_2] : memref<128x128xbf16, #tpu.memory_space<vmem>>, vector<128x128xbf16>
    %cst = arith.constant dense<0.000000e+00> : vector<256x128xf32>
    %2 = tpu.matmul %0, %1, %cst {dimension_numbers = #tpu.dot_dimension_numbers<[1], [0], [0], [1], [0, 0, 1, 1], [], []>} : vector<256x128xbf16>, vector<128x128xbf16>, vector<256x128xf32> -> vector<256x128xf32>
    %c0_3 = arith.constant 0 : index
    %c0_4 = arith.constant 0 : index
    %3 = vector.load %arg3[%c0_3, %c0_4] : memref<256x128xf32, #tpu.memory_space<vmem>>, vector<256x128xf32>
    tpu.vector_store %arg3[%c0_3, %c0_4], %2 {strides = array<i32>} : memref<256x128xf32, #tpu.memory_space<vmem>>, vector<256x128xf32>,
    %cst_5 = arith.constant 0.000000e+00 : f32
    %4 = vector.broadcast %cst_5 : f32 to vector<8x128xf32>
    %c0_6 = arith.constant 0 : index
    %c0_7 = arith.constant 0 : index
    %5 = vector.load %arg4[%c0_6, %c0_7] : memref<8x128xf32, #tpu.memory_space<vmem>>, vector<8x128xf32>
    tpu.vector_store %arg4[%c0_6, %c0_7], %4 {strides = array<i32>} : memref<8x128xf32, #tpu.memory_space<vmem>>, vector<8x128xf32>,
    %cst_8 = arith.constant 0.000000e+00 : f32
    %6 = vector.broadcast %cst_8 : f32 to vector<8x128xf32>
    %c0_9 = arith.constant 0 : index
    %c0_10 = arith.constant 0 : index
    %7 = vector.load %arg5[%c0_9, %c0_10] : memref<8x128xf32, #tpu.memory_space<vmem>>, vector<8x128xf32>
    tpu.vector_store %arg5[%c0_9, %c0_10], %6 {strides = array<i32>} : memref<8x128xf32, #tpu.memory_space<vmem>>, vector<8x128xf32>,
    %cst_11 = arith.constant dense<0.000000e+00> : vector<128xf32>
    %8 = vector.multi_reduction <add>, %2, %cst_11 [0] : vector<256x128xf32> to vector<128xf32>
    %9 = vector.shape_cast %8 : vector<128xf32> to vector<1x128xf32>
    %c0_12 = arith.constant 0 : index
    %c0_13 = arith.constant 0 : index
    %10 = vector.load %arg4[%c0_12, %c0_13] : memref<8x128xf32, #tpu.memory_space<vmem>>, vector<1x128xf32>
    tpu.vector_store %arg4[%c0_12, %c0_13], %9 {strides = array<i32>} : memref<8x128xf32, #tpu.memory_space<vmem>>, vector<1x128xf32>,
    %11 = arith.mulf %2, %2 : vector<256x128xf32>
    %cst_14 = arith.constant dense<0.000000e+00> : vector<128xf32>
    %12 = vector.multi_reduction <add>, %11, %cst_14 [0] : vector<256x128xf32> to vector<128xf32>
    %13 = vector.shape_cast %12 : vector<128xf32> to vector<1x128xf32>
    %c0_15 = arith.constant 0 : index
    %c0_16 = arith.constant 0 : index
    %14 = vector.load %arg5[%c0_15, %c0_16] : memref<8x128xf32, #tpu.memory_space<vmem>>, vector<1x128xf32>
    tpu.vector_store %arg5[%c0_15, %c0_16], %13 {strides = array<i32>} : memref<8x128xf32, #tpu.memory_space<vmem>>, vector<1x128xf32>,
    return
  }
  func.func @transform_0(%arg0: i32) -> (i32, i32) {
    %c0_i32 = arith.constant 0 : i32
    %c0_i32_0 = arith.constant 0 : i32
    return %arg0, %c0_i32 : i32, i32
  }
  func.func @transform_1(%arg0: i32) -> (i32, i32) {
    %c0_i32 = arith.constant 0 : i32
    %c0_i32_0 = arith.constant 0 : i32
    %c0_i32_1 = arith.constant 0 : i32
    return %c0_i32, %c0_i32_0 : i32, i32
  }
  func.func @transform_2(%arg0: i32) -> (i32, i32) {
    %c0_i32 = arith.constant 0 : i32
    %c0_i32_0 = arith.constant 0 : i32
    return %arg0, %c0_i32 : i32, i32
  }
  func.func @transform_3(%arg0: i32) -> (i32, i32) {
    %c0_i32 = arith.constant 0 : i32
    %c0_i32_0 = arith.constant 0 : i32
    return %arg0, %c0_i32 : i32, i32
  }
  func.func @transform_4(%arg0: i32) -> (i32, i32) {
    %c0_i32 = arith.constant 0 : i32
    %c0_i32_0 = arith.constant 0 : i32
    return %arg0, %c0_i32 : i32, i32
  }
}

</mosaic_0001>

<bundles_post_ra>
// kernel: double_conv4_1.3
= control target key start
LH: loop header
LB: loop body
LE: loop exit
PB: predicated region body
PF: predicated region fallthrough
CT: control target
= control target key end

     0   :  { %s480_s0 = inlined_call_operand.vmem [shape: f32[256,128], index: 0, kind: input, shape index: {}, may-alias: {0,3}]   ;;  %s481_s1 = inlined_call_operand.vmem [shape: f32[1,128], index: 1, kind: input, shape index: {}]   ;;  %s482_s2 = inlined_call_operand.vmem [shape: f32[1,128], index: 2, kind: input, shape index: {}]   ;;  %s483_s3 = inlined_call_operand.vmem [shape: f32[256,128], index: 3, kind: output, shape index: {}, may-alias: {0,3}]  }
   0x1   :  { %v14_v0 = vld [vmem:[%s480_s0] sm:$0xff]  ;;  %v15_v4 = vld [vmem:[%s480_s0 + $0x8] sm:$0xff]  ;;  %v16_v5 = vld [vmem:[%s480_s0 + $0x10] sm:$0xff] }
   0x2   :  { %v220_v1 = vld [vmem:[%s481_s1] ss:$0 sm:$0xff]  ;;  %v17_v6 = vld [vmem:[%s480_s0 + $0x18] sm:$0xff]  ;;  %v19_v11 = vld [vmem:[%s480_s0 + $0x28] sm:$0xff] }
   0x3   :  { %v225_v2 = vld [vmem:[%s482_s2] ss:$0 sm:$0xff]  ;;  %v53_v3 = vmul.f32 %v220_v1, %v14_v0  ;;  %v54_v7 = vmul.f32 %v220_v1, %v15_v4  ;;  %v55_v8 = vmul.f32 %v220_v1, %v16_v5  ;;  %v56_v9 = vmul.f32 %v220_v1, %v17_v6  ;;  %v20_v12 = vld [vmem:[%s480_s0 + $0x30] sm:$0xff]  ;;  %v21_v17 = vld [vmem:[%s480_s0 + $0x38] sm:$0xff] }
   0x4   :  { %v18_v10 = vld [vmem:[%s480_s0 + $0x20] sm:$0xff]  ;;  %v58_v15 = vmul.f32 %v220_v1, %v19_v11  ;;  %v59_v16 = vmul.f32 %v220_v1, %v20_v12  ;;  %v60_v21 = vmul.f32 %v220_v1, %v21_v17  ;;  %v23_v27 = vld [vmem:[%s480_s0 + $0x48] sm:$0xff]  ;;  %v24_v28 = vld [vmem:[%s480_s0 + $0x50] sm:$0xff] }
   0x5   :  { %v92_v13 = vadd.f32 %v225_v2, %v53_v3  ;;  %v57_v14 = vmul.f32 %v220_v1, %v18_v10  ;;  %v93_v18 = vadd.f32 %v225_v2, %v54_v7  ;;  %v94_v19 = vadd.f32 %v225_v2, %v55_v8  ;;  %v22_v22 = vld [vmem:[%s480_s0 + $0x40] sm:$0xff]  ;;  %v25_v29 = vld [vmem:[%s480_s0 + $0x58] sm:$0xff]  ;;  %v27_v35 = vld [vmem:[%s480_s0 + $0x68] sm:$0xff] }
   0x6   :  { %v95_v20 = vadd.f32 %v225_v2, %v56_v9  ;;  %v97_v25 = vadd.f32 %v225_v2, %v58_v15  ;;  %v98_v26 = vadd.f32 %v225_v2, %v59_v16  ;;  %v99_v33 = vadd.f32 %v225_v2, %v60_v21  ;;  %v26_v34 = vld [vmem:[%s480_s0 + $0x60] sm:$0xff]  ;;  %v28_v36 = vld [vmem:[%s480_s0 + $0x70] sm:$0xff] }
   0x7   :  { %v124_v23 = vmax.f32 %v92_v13, 0.0  ;;  %v96_v24 = vadd.f32 %v225_v2, %v57_v14  ;;  %v125_v30 = vmax.f32 %v93_v18, 0.0  ;;  %v126_v31 = vmax.f32 %v94_v19, 0.0 }
   0x8   :  { %v127_v32 = vmax.f32 %v95_v20, 0.0  ;;  %v129_v38 = vmax.f32 %v97_v25, 0.0  ;;  %v130_v39 = vmax.f32 %v98_v26, 0.0  ;;  %v61_v40 = vmul.f32 %v220_v1, %v22_v22 }
   0x9   :  { %156 = vst [vmem:[%s483_s3] sm:$0xff] %v124_v23  ;;  %v128_v37 = vmax.f32 %v96_v24, 0.0  ;;  %v131_v42 = vmax.f32 %v99_v33, 0.0  ;;  %v62_v43 = vmul.f32 %v220_v1, %v23_v27  ;;  %v63_v44 = vmul.f32 %v220_v1, %v24_v28 }
   0xa   :  { %v64_v45 = vmul.f32 %v220_v1, %v25_v29  ;;  %v100_v46 = vadd.f32 %v225_v2, %v61_v40  ;;  %v65_v47 = vmul.f32 %v220_v1, %v26_v34  ;;  %v66_v48 = vmul.f32 %v220_v1, %v27_v35 }
   0xb   :  { %v67_v49 = vmul.f32 %v220_v1, %v28_v36  ;;  %v101_v50 = vadd.f32 %v225_v2, %v62_v43  ;;  %v102_v51 = vadd.f32 %v225_v2, %v63_v44 }
   0xc   :  { %v103_v52 = vadd.f32 %v225_v2, %v64_v45  ;;  %v132_v55 = vmax.f32 %v100_v46, 0.0  ;;  %v104_v56 = vadd.f32 %v225_v2, %v65_v47  ;;  %v105_v57 = vadd.f32 %v225_v2, %v66_v48 }
   0xd   :  { %v106_v58 = vadd.f32 %v225_v2, %v67_v49  ;;  %v133_v62 = vmax.f32 %v101_v50, 0.0  ;;  %v134_v63 = vmax.f32 %v102_v51, 0.0 }
   0xe   :  { %v135_v0 = vmax.f32 %v103_v52, 0.0  ;;  %v136_v7 = vmax.f32 %v104_v56, 0.0  ;;  %v137_v8 = vmax.f32 %v105_v57, 0.0 }
   0xf   :  { %v138_v9 = vmax.f32 %v106_v58, 0.0 }
  0x10   :  { %v29_v41 = vld [vmem:[%s480_s0 + $0x78] sm:$0xff] }
  0x11   :  { %157 = vst [vmem:[%s483_s3 + $0x8] sm:$0xff] %v125_v30  ;;  %158 = vst [vmem:[%s483_s3 + $0x10] sm:$0xff] %v126_v31  ;;  %v68_v53 = vmul.f32 %v220_v1, %v29_v41 }
  0x12   :  { %159 = vst [vmem:[%s483_s3 + $0x18] sm:$0xff] %v127_v32  ;;  %160 = vst [vmem:[%s483_s3 + $0x20] sm:$0xff] %v128_v37 }
  0x13   :  { %161 = vst [vmem:[%s483_s3 + $0x28] sm:$0xff] %v129_v38  ;;  %162 = vst [vmem:[%s483_s3 + $0x30] sm:$0xff] %v130_v39  ;;  %v107_v3 = vadd.f32 %v225_v2, %v68_v53 }
  0x14   :  { %163 = vst [vmem:[%s483_s3 + $0x38] sm:$0xff] %v131_v42 }
  0x15   :  { %v139_v12 = vmax.f32 %v107_v3, 0.0 }
  0x1b   :  { %v30_v54 = vld [vmem:[%s480_s0 + $0x80] sm:$0xff]  ;;  %v31_v59 = vld [vmem:[%s480_s0 + $0x88] sm:$0xff]  ;;  %v32_v60 = vld [vmem:[%s480_s0 + $0x90] sm:$0xff] }
  0x1c   :  { %v33_v61 = vld [vmem:[%s480_s0 + $0x98] sm:$0xff]  ;;  %v34_v4 = vld [vmem:[%s480_s0 + $0xa0] sm:$0xff]  ;;  %v35_v5 = vld [vmem:[%s480_s0 + $0xa8] sm:$0xff]  ;;  %v69_v10 = vmul.f32 %v220_v1, %v30_v54  ;;  %v70_v13 = vmul.f32 %v220_v1, %v31_v59  ;;  %v71_v14 = vmul.f32 %v220_v1, %v32_v60 }
  0x1d   :  { %v36_v6 = vld [vmem:[%s480_s0 + $0xb0] sm:$0xff]  ;;  %v72_v15 = vmul.f32 %v220_v1, %v33_v61  ;;  %v73_v17 = vmul.f32 %v220_v1, %v34_v4  ;;  %v74_v18 = vmul.f32 %v220_v1, %v35_v5 }
  0x1e   :  { %164 = vst [vmem:[%s483_s3 + $0x40] sm:$0xff] %v132_v55  ;;  %v108_v16 = vadd.f32 %v225_v2, %v69_v10  ;;  %v75_v19 = vmul.f32 %v220_v1, %v36_v6  ;;  %v109_v20 = vadd.f32 %v225_v2, %v70_v13  ;;  %v110_v21 = vadd.f32 %v225_v2, %v71_v14 }
  0x1f   :  { %v111_v22 = vadd.f32 %v225_v2, %v72_v15  ;;  %v112_v26 = vadd.f32 %v225_v2, %v73_v17  ;;  %v113_v27 = vadd.f32 %v225_v2, %v74_v18 }
  0x20   :  { %v140_v25 = vmax.f32 %v108_v16, 0.0  ;;  %v114_v28 = vadd.f32 %v225_v2, %v75_v19  ;;  %v141_v32 = vmax.f32 %v109_v20, 0.0  ;;  %v142_v33 = vmax.f32 %v110_v21, 0.0 }
  0x21   :  { %v143_v34 = vmax.f32 %v111_v22, 0.0  ;;  %v144_v39 = vmax.f32 %v112_v26, 0.0  ;;  %v145_v40 = vmax.f32 %v113_v27, 0.0 }
  0x22   :  { %v146_v41 = vmax.f32 %v114_v28, 0.0 }
  0x25   :  { %v37_v11 = vld [vmem:[%s480_s0 + $0xb8] sm:$0xff] }
  0x26   :  { %165 = vst [vmem:[%s483_s3 + $0x48] sm:$0xff] %v133_v62  ;;  %166 = vst [vmem:[%s483_s3 + $0x50] sm:$0xff] %v134_v63  ;;  %v76_v23 = vmul.f32 %v220_v1, %v37_v11 }
  0x27   :  { %167 = vst [vmem:[%s483_s3 + $0x58] sm:$0xff] %v135_v0  ;;  %168 = vst [vmem:[%s483_s3 + $0x60] sm:$0xff] %v136_v7 }
  0x28   :  { %169 = vst [vmem:[%s483_s3 + $0x68] sm:$0xff] %v137_v8  ;;  %170 = vst [vmem:[%s483_s3 + $0x70] sm:$0xff] %v138_v9  ;;  %v115_v35 = vadd.f32 %v225_v2, %v76_v23 }
  0x29   :  { %171 = vst [vmem:[%s483_s3 + $0x78] sm:$0xff] %v139_v12 }
  0x2a   :  { %v147_v44 = vmax.f32 %v115_v35, 0.0 }
  0x30   :  { %v38_v24 = vld [vmem:[%s480_s0 + $0xc0] sm:$0xff]  ;;  %v39_v29 = vld [vmem:[%s480_s0 + $0xc8] sm:$0xff]  ;;  %v40_v30 = vld [vmem:[%s480_s0 + $0xd0] sm:$0xff] }
  0x31   :  { %v41_v31 = vld [vmem:[%s480_s0 + $0xd8] sm:$0xff]  ;;  %v42_v36 = vld [vmem:[%s480_s0 + $0xe0] sm:$0xff]  ;;  %v43_v37 = vld [vmem:[%s480_s0 + $0xe8] sm:$0xff]  ;;  %v77_v42 = vmul.f32 %v220_v1, %v38_v24  ;;  %v78_v45 = vmul.f32 %v220_v1, %v39_v29  ;;  %v79_v46 = vmul.f32 %v220_v1, %v40_v30 }
  0x32   :  { %v44_v38 = vld [vmem:[%s480_s0 + $0xf0] sm:$0xff]  ;;  %v80_v47 = vmul.f32 %v220_v1, %v41_v31  ;;  %v81_v49 = vmul.f32 %v220_v1, %v42_v36  ;;  %v82_v50 = vmul.f32 %v220_v1, %v43_v37 }
  0x33   :  { %172 = vst [vmem:[%s483_s3 + $0x80] sm:$0xff] %v140_v25  ;;  %v116_v48 = vadd.f32 %v225_v2, %v77_v42  ;;  %v83_v51 = vmul.f32 %v220_v1, %v44_v38  ;;  %v117_v52 = vadd.f32 %v225_v2, %v78_v45  ;;  %v118_v53 = vadd.f32 %v225_v2, %v79_v46 }
  0x34   :  { %v119_v54 = vadd.f32 %v225_v2, %v80_v47  ;;  %v120_v57 = vadd.f32 %v225_v2, %v81_v49  ;;  %v121_v58 = vadd.f32 %v225_v2, %v82_v50 }
  0x35   :  { %v148_v56 = vmax.f32 %v116_v48, 0.0  ;;  %v122_v59 = vadd.f32 %v225_v2, %v83_v51  ;;  %v149_v60 = vmax.f32 %v117_v52, 0.0  ;;  %v150_v61 = vmax.f32 %v118_v53, 0.0 }
  0x36   :  { %v151_v62 = vmax.f32 %v119_v54, 0.0  ;;  %v152_v0 = vmax.f32 %v120_v57, 0.0  ;;  %v153_v3 = vmax.f32 %v121_v58, 0.0 }
  0x37   :  { %v154_v4 = vmax.f32 %v122_v59, 0.0 }
  0x3a   :  { %v45_v43 = vld [vmem:[%s480_s0 + $0xf8] sm:$0xff] }
  0x3b   :  { %173 = vst [vmem:[%s483_s3 + $0x88] sm:$0xff] %v141_v32  ;;  %174 = vst [vmem:[%s483_s3 + $0x90] sm:$0xff] %v142_v33  ;;  %v84_v55 = vmul.f32 %v220_v1, %v45_v43 }
  0x3c   :  { %175 = vst [vmem:[%s483_s3 + $0x98] sm:$0xff] %v143_v34  ;;  %176 = vst [vmem:[%s483_s3 + $0xa0] sm:$0xff] %v144_v39 }
  0x3d   :  { %177 = vst [vmem:[%s483_s3 + $0xa8] sm:$0xff] %v145_v40  ;;  %178 = vst [vmem:[%s483_s3 + $0xb0] sm:$0xff] %v146_v41  ;;  %v123_v63 = vadd.f32 %v225_v2, %v84_v55 }
  0x3e   :  { %179 = vst [vmem:[%s483_s3 + $0xb8] sm:$0xff] %v147_v44  ;;  %180 = vst [vmem:[%s483_s3 + $0xc0] sm:$0xff] %v148_v56 }
  0x3f   :  { %181 = vst [vmem:[%s483_s3 + $0xc8] sm:$0xff] %v149_v60  ;;  %182 = vst [vmem:[%s483_s3 + $0xd0] sm:$0xff] %v150_v61  ;;  %v155_v1 = vmax.f32 %v123_v63, 0.0 }
  0x40   :  { %183 = vst [vmem:[%s483_s3 + $0xd8] sm:$0xff] %v151_v62  ;;  %184 = vst [vmem:[%s483_s3 + $0xe0] sm:$0xff] %v152_v0 }
  0x41   :  { %185 = vst [vmem:[%s483_s3 + $0xe8] sm:$0xff] %v153_v3  ;;  %186 = vst [vmem:[%s483_s3 + $0xf0] sm:$0xff] %v154_v4 }
  0x42   :  { %187 = vst [vmem:[%s483_s3 + $0xf8] sm:$0xff] %v155_v1 }

// kernel: double_conv4_1.2
= control target key start
LH: loop header
LB: loop body
LE: loop exit
PB: predicated region body
PF: predicated region fallthrough
CT: control target
= control target key end

     0   :  { %v659_v24 = vmov 0.0   ;;  %s949_s1 = inlined_call_operand.vmem [shape: bf16[128,128], index: 1, kind: input, shape index: {}]   ;;  %s950_s0 = inlined_call_operand.vmem [shape: bf16[256,128], index: 0, kind: input, shape index: {}]   ;;  %s951_s3 = inlined_call_operand.vmem [shape: f32[8,128], index: 3, kind: output, shape index: {1}]   ;;  %s952_s4 = inlined_call_operand.vmem [shape: f32[8,128], index: 4, kind: output, shape index: {2}]   ;;  %s953_s2 = inlined_call_operand.vmem [shape: f32[256,128], index: 2, kind: output, shape index: {0}]  }
   0x1   :  { %v635_v0 = vld [vmem:[%s949_s1 + $0x38] sm:$0xff]   ;;  %v636_v1 = vld [vmem:[%s949_s1 + $0x30] sm:$0xff]   ;;  %v637_v2 = vld [vmem:[%s949_s1 + $0x28] sm:$0xff]   ;;  %400 = vst [vmem:[%s951_s3] sm:$0xff] %v659_v24 }
   0x2   :  { %570 = vmatprep.subr.bf16.mxu0 %v635_v0  ;;  %618 = vmatprep.subr.bf16.mxu1 %v635_v0  ;;  %v638_v3 = vld [vmem:[%s949_s1 + $0x20] sm:$0xff]   ;;  %v639_v5 = vld [vmem:[%s949_s1 + $0x18] sm:$0xff]   ;;  %v640_v6 = vld [vmem:[%s949_s1 + $0x10] sm:$0xff]   ;;  %401 = vst [vmem:[%s952_s4] sm:$0xff] %v659_v24 }
   0x3   :  { %571 = vmatpush3.bf16.msra.mxu0 %v635_v0  ;;  %626 = vmatpush3.bf16.msra.mxu1 %v635_v0  ;;  %v643_v4 = vld [vmem:[%s950_s0] sm:$0xff]   ;;  %v641_v8 = vld [vmem:[%s949_s1 + $0x8] sm:$0xff]   ;;  %v645_v12 = vld [vmem:[%s950_s0 + $0x10] sm:$0xff]  }
   0x4   :  { %572 = vmatprep.subr.bf16.mxu0 %v636_v1  ;;  %619 = vmatprep.subr.bf16.mxu1 %v636_v1  ;;  %v651_v7 = vld [vmem:[%s950_s0 + $0x40] sm:$0xff]   ;;  %v644_v10 = vld [vmem:[%s950_s0 + $0x8] sm:$0xff]   ;;  %v653_v13 = vld [vmem:[%s950_s0 + $0x50] sm:$0xff]  }
   0x5   :  { %586 = vmatprep.mubr.bf16.mxu0 %v643_v4  ;;  %602 = vmatprep.mubr.bf16.mxu1 %v651_v7  ;;  %v642_v9 = vld [vmem:[%s949_s1] sm:$0xff]   ;;  %v652_v11 = vld [vmem:[%s950_s0 + $0x48] sm:$0xff]   ;;  %v646_v14 = vld [vmem:[%s950_s0 + $0x18] sm:$0xff]  }
   0x6   :  { %v654_v15 = vld [vmem:[%s950_s0 + $0x58] sm:$0xff]   ;;  %v647_v16 = vld [vmem:[%s950_s0 + $0x20] sm:$0xff]   ;;  %v648_v18 = vld [vmem:[%s950_s0 + $0x28] sm:$0xff]  }
   0x7   :  { %573 = vmatpush3.bf16.msra.mxu0 %v636_v1  ;;  %627 = vmatpush3.bf16.msra.mxu1 %v636_v1  ;;  %v655_v17 = vld [vmem:[%s950_s0 + $0x60] sm:$0xff]   ;;  %v656_v19 = vld [vmem:[%s950_s0 + $0x68] sm:$0xff]   ;;  %v649_v20 = vld [vmem:[%s950_s0 + $0x30] sm:$0xff]  }
   0x8   :  { %574 = vmatprep.subr.bf16.mxu0 %v637_v2  ;;  %620 = vmatprep.subr.bf16.mxu1 %v637_v2  ;;  %v657_v21 = vld [vmem:[%s950_s0 + $0x70] sm:$0xff]   ;;  %v650_v22 = vld [vmem:[%s950_s0 + $0x38] sm:$0xff]  }
   0x9   :  { %v658_v23 = vld [vmem:[%s950_s0 + $0x78] sm:$0xff]  }
   0xb   :  { %575 = vmatpush3.bf16.msra.mxu0 %v637_v2  ;;  %628 = vmatpush3.bf16.msra.mxu1 %v637_v2 }
   0xc   :  { %576 = vmatprep.subr.bf16.mxu0 %v638_v3  ;;  %621 = vmatprep.subr.bf16.mxu1 %v638_v3 }
   0xf   :  { %577 = vmatpush3.bf16.msra.mxu0 %v638_v3  ;;  %629 = vmatpush3.bf16.msra.mxu1 %v638_v3 }
  0x10   :  { %578 = vmatprep.subr.bf16.mxu0 %v639_v5  ;;  %622 = vmatprep.subr.bf16.mxu1 %v639_v5 }
  0x13   :  { %579 = vmatpush3.bf16.msra.mxu0 %v639_v5  ;;  %630 = vmatpush3.bf16.msra.mxu1 %v639_v5 }
  0x14   :  { %580 = vmatprep.subr.bf16.mxu0 %v640_v6  ;;  %623 = vmatprep.subr.bf16.mxu1 %v640_v6 }
  0x17   :  { %581 = vmatpush3.bf16.msra.mxu0 %v640_v6  ;;  %631 = vmatpush3.bf16.msra.mxu1 %v640_v6 }
  0x18   :  { %582 = vmatprep.subr.bf16.mxu0 %v641_v8  ;;  %624 = vmatprep.subr.bf16.mxu1 %v641_v8 }
  0x1b   :  { %583 = vmatpush3.bf16.msra.mxu0 %v641_v8  ;;  %632 = vmatpush3.bf16.msra.mxu1 %v641_v8 }
  0x1c   :  { %584 = vmatprep.subr.bf16.mxu0 %v642_v9  ;;  %625 = vmatprep.subr.bf16.mxu1 %v642_v9 }
  0x1f   :  { %585 = vmatpush3.bf16.msra.mxu0 %v642_v9  ;;  %633 = vmatpush3.bf16.msra.mxu1 %v642_v9 }
  0x22   :  { %587 = vmatmul.mubr.bf16.vlgmr.msra.gmra.mxu0 %v644_v10  ;;  %603 = vmatmul.mubr.bf16.vlgmr.msra.gmra.mxu1 %v652_v11 }
  0x23   :  { %590 = vmatprep.mubr.bf16.mxu0 %v645_v12  ;;  %606 = vmatprep.mubr.bf16.mxu1 %v653_v13 }
  0x2a   :  { %591 = vmatmul.mubr.bf16.gmra.mxu0 %v646_v14  ;;  %607 = vmatmul.mubr.bf16.gmra.mxu1 %v654_v15 }
  0x2b   :  { %594 = vmatprep.mubr.bf16.mxu0 %v647_v16  ;;  %610 = vmatprep.mubr.bf16.mxu1 %v655_v17 }
  0x32   :  { %595 = vmatmul.mubr.bf16.gmra.mxu0 %v648_v18  ;;  %611 = vmatmul.mubr.bf16.gmra.mxu1 %v656_v19 }
  0x33   :  { %598 = vmatprep.mubr.bf16.mxu0 %v649_v20  ;;  %614 = vmatprep.mubr.bf16.mxu1 %v657_v21 }
  0x3a   :  { %599 = vmatmul.mubr.bf16.gmra.mxu0 %v650_v22  ;;  %615 = vmatmul.mubr.bf16.gmra.mxu1 %v658_v23 }
  0xe2   :  { %v588_v25 = vpop.f32.mrf.mxu0  ;;  %v763_v26 = vpop.f32.mrf.mxu1 }
  0xe3   :  { %370 = vst [vmem:[%s953_s2 + $0x10] sm:$0xff] %v588_v25  ;;  %386 = vst [vmem:[%s953_s2 + $0x90] sm:$0xff] %v763_v26  ;;  %v442_v38 = vmul.f32 %v588_v25, %v588_v25 }
  0xe4   :  { %v241_v27 = vpop.f32.mrf.mxu0  ;;  %v772_v28 = vpop.f32.mrf.mxu1 }
  0xe5   :  { %368 = vst [vmem:[%s953_s2] sm:$0xff] %v241_v27  ;;  %384 = vst [vmem:[%s953_s2 + $0x80] sm:$0xff] %v772_v28  ;;  %v440_v33 = vmul.f32 %v241_v27, %v241_v27 }
  0xe6   :  { %v589_v29 = vpop.f32.mrf.mxu0  ;;  %v781_v30 = vpop.f32.mrf.mxu1 }
  0xe7   :  { %371 = vst [vmem:[%s953_s2 + $0x18] sm:$0xff] %v589_v29  ;;  %387 = vst [vmem:[%s953_s2 + $0x98] sm:$0xff] %v781_v30  ;;  %v443_v43 = vmul.f32 %v589_v29, %v589_v29 }
  0xe8   :  { %v244_v31 = vpop.f32.mrf.mxu0  ;;  %v790_v32 = vpop.f32.mrf.mxu1 }
  0xe9   :  { %369 = vst [vmem:[%s953_s2 + $0x8] sm:$0xff] %v244_v31  ;;  %v402_v34 = vadd.f32 %v244_v31, %v241_v27  ;;  %v441_v35 = vmul.f32 %v244_v31, %v244_v31  ;;  %385 = vst [vmem:[%s953_s2 + $0x88] sm:$0xff] %v790_v32 }
  0xea   :  { %v592_v36 = vpop.f32.mrf.mxu0  ;;  %v799_v37 = vpop.f32.mrf.mxu1 }
  0xeb   :  { %v403_v39 = vadd.f32 %v588_v25, %v402_v34  ;;  %v472_v40 = vadd.f32 %v441_v35, %v440_v33  ;;  %374 = vst [vmem:[%s953_s2 + $0x30] sm:$0xff] %v592_v36  ;;  %390 = vst [vmem:[%s953_s2 + $0xb0] sm:$0xff] %v799_v37  ;;  %v446_v58 = vmul.f32 %v592_v36, %v592_v36 }
  0xec   :  { %v257_v41 = vpop.f32.mrf.mxu0  ;;  %v808_v42 = vpop.f32.mrf.mxu1 }
  0xed   :  { %v473_v44 = vadd.f32 %v472_v40, %v442_v38  ;;  %372 = vst [vmem:[%s953_s2 + $0x20] sm:$0xff] %v257_v41  ;;  %v404_v45 = vadd.f32 %v589_v29, %v403_v39  ;;  %388 = vst [vmem:[%s953_s2 + $0xa0] sm:$0xff] %v808_v42  ;;  %v444_v49 = vmul.f32 %v257_v41, %v257_v41 }
  0xee   :  { %v593_v46 = vpop.f32.mrf.mxu0  ;;  %v817_v47 = vpop.f32.mrf.mxu1 }
  0xef   :  { %v405_v48 = vadd.f32 %v404_v45, %v257_v41  ;;  %v474_v50 = vadd.f32 %v473_v44, %v443_v43  ;;  %375 = vst [vmem:[%s953_s2 + $0x38] sm:$0xff] %v593_v46  ;;  %391 = vst [vmem:[%s953_s2 + $0xb8] sm:$0xff] %v817_v47  ;;  %v447_v63 = vmul.f32 %v593_v46, %v593_v46 }
  0xf0   :  { %v260_v51 = vpop.f32.mrf.mxu0  ;;  %v826_v52 = vpop.f32.mrf.mxu1  ;;  %v456_v44 = vmul.f32 %v772_v28, %v772_v28 }
  0xf1   :  { %v475_v53 = vadd.f32 %v474_v50, %v444_v49  ;;  %373 = vst [vmem:[%s953_s2 + $0x28] sm:$0xff] %v260_v51  ;;  %v406_v54 = vadd.f32 %v405_v48, %v260_v51  ;;  %v445_v55 = vmul.f32 %v260_v51, %v260_v51  ;;  %389 = vst [vmem:[%s953_s2 + $0xa8] sm:$0xff] %v826_v52 }
  0xf2   :  { %v596_v56 = vpop.f32.mrf.mxu0  ;;  %v835_v57 = vpop.f32.mrf.mxu1  ;;  %v457_v49 = vmul.f32 %v790_v32, %v790_v32  ;;  %v458_v51 = vmul.f32 %v763_v26, %v763_v26 }
  0xf3   :  { %v407_v59 = vadd.f32 %v592_v36, %v406_v54  ;;  %v476_v60 = vadd.f32 %v475_v53, %v445_v55  ;;  %378 = vst [vmem:[%s953_s2 + $0x50] sm:$0xff] %v596_v56  ;;  %394 = vst [vmem:[%s953_s2 + $0xd0] sm:$0xff] %v835_v57  ;;  %v450_v14 = vmul.f32 %v596_v56, %v596_v56 }
  0xf4   :  { %v273_v61 = vpop.f32.mrf.mxu0  ;;  %v844_v62 = vpop.f32.mrf.mxu1  ;;  %v459_v55 = vmul.f32 %v781_v30, %v781_v30 }
  0xf5   :  { %v477_v0 = vadd.f32 %v476_v60, %v446_v58  ;;  %376 = vst [vmem:[%s953_s2 + $0x40] sm:$0xff] %v273_v61  ;;  %v408_v1 = vadd.f32 %v593_v46, %v407_v59  ;;  %392 = vst [vmem:[%s953_s2 + $0xc0] sm:$0xff] %v844_v62  ;;  %v448_v5 = vmul.f32 %v273_v61, %v273_v61 }
  0xf6   :  { %v597_v2 = vpop.f32.mrf.mxu0  ;;  %v853_v3 = vpop.f32.mrf.mxu1  ;;  %v460_v59 = vmul.f32 %v808_v42, %v808_v42 }
  0xf7   :  { %v409_v4 = vadd.f32 %v408_v1, %v273_v61  ;;  %v478_v6 = vadd.f32 %v477_v0, %v447_v63  ;;  %379 = vst [vmem:[%s953_s2 + $0x58] sm:$0xff] %v597_v2  ;;  %395 = vst [vmem:[%s953_s2 + $0xd8] sm:$0xff] %v853_v3  ;;  %v451_v19 = vmul.f32 %v597_v2, %v597_v2 }
  0xf8   :  { %v276_v7 = vpop.f32.mrf.mxu0  ;;  %v862_v8 = vpop.f32.mrf.mxu1  ;;  %v461_v63 = vmul.f32 %v826_v52, %v826_v52 }
  0xf9   :  { %v479_v9 = vadd.f32 %v478_v6, %v448_v5  ;;  %377 = vst [vmem:[%s953_s2 + $0x48] sm:$0xff] %v276_v7  ;;  %v410_v10 = vadd.f32 %v409_v4, %v276_v7  ;;  %v449_v11 = vmul.f32 %v276_v7, %v276_v7  ;;  %393 = vst [vmem:[%s953_s2 + $0xc8] sm:$0xff] %v862_v8 }
  0xfa   :  { %v600_v12 = vpop.f32.mrf.mxu0  ;;  %v871_v13 = vpop.f32.mrf.mxu1  ;;  %v464_v5 = vmul.f32 %v844_v62, %v844_v62 }
  0xfb   :  { %v411_v15 = vadd.f32 %v596_v56, %v410_v10  ;;  %v480_v16 = vadd.f32 %v479_v9, %v449_v11  ;;  %382 = vst [vmem:[%s953_s2 + $0x70] sm:$0xff] %v600_v12  ;;  %398 = vst [vmem:[%s953_s2 + $0xf0] sm:$0xff] %v871_v13  ;;  %v454_v36 = vmul.f32 %v600_v12, %v600_v12 }
  0xfc   :  { %v289_v17 = vpop.f32.mrf.mxu0  ;;  %v353_v18 = vpop.f32.mrf.mxu1  ;;  %v465_v9 = vmul.f32 %v862_v8, %v862_v8 }
  0xfd   :  { %v481_v20 = vadd.f32 %v480_v16, %v450_v14  ;;  %380 = vst [vmem:[%s953_s2 + $0x60] sm:$0xff] %v289_v17  ;;  %v412_v21 = vadd.f32 %v597_v2, %v411_v15  ;;  %396 = vst [vmem:[%s953_s2 + $0xe0] sm:$0xff] %v353_v18  ;;  %v452_v25 = vmul.f32 %v289_v17, %v289_v17 }
  0xfe   :  { %v601_v22 = vpop.f32.mrf.mxu0  ;;  %v886_v23 = vpop.f32.mrf.mxu1  ;;  %v468_v15 = vmul.f32 %v353_v18, %v353_v18 }
  0xff   :  { %v413_v24 = vadd.f32 %v412_v21, %v289_v17  ;;  %v482_v27 = vadd.f32 %v481_v20, %v451_v19  ;;  %383 = vst [vmem:[%s953_s2 + $0x78] sm:$0xff] %v601_v22  ;;  %399 = vst [vmem:[%s953_s2 + $0xf8] sm:$0xff] %v886_v23  ;;  %v455_v40 = vmul.f32 %v601_v22, %v601_v22 }
 0x100   :  { %v292_v29 = vpop.f32.mrf.mxu0  ;;  %v356_v31 = vpop.f32.mrf.mxu1 }
 0x101   :  { %v483_v33 = vadd.f32 %v482_v27, %v452_v25  ;;  %381 = vst [vmem:[%s953_s2 + $0x68] sm:$0xff] %v292_v29  ;;  %v414_v34 = vadd.f32 %v413_v24, %v292_v29  ;;  %v453_v35 = vmul.f32 %v292_v29, %v292_v29  ;;  %397 = vst [vmem:[%s953_s2 + $0xe8] sm:$0xff] %v356_v31 }
 0x102   :  { %v469_v20 = vmul.f32 %v356_v31, %v356_v31 }
 0x103   :  { %v415_v38 = vadd.f32 %v600_v12, %v414_v34  ;;  %v484_v39 = vadd.f32 %v483_v33, %v453_v35 }
 0x105   :  { %v416_v41 = vadd.f32 %v601_v22, %v415_v38  ;;  %v485_v43 = vadd.f32 %v484_v39, %v454_v36 }
 0x107   :  { %v486_v45 = vadd.f32 %v485_v43, %v455_v40  ;;  %v417_v46 = vadd.f32 %v416_v41, %v772_v28 }
 0x109   :  { %v418_v48 = vadd.f32 %v417_v46, %v790_v32  ;;  %v487_v50 = vadd.f32 %v486_v45, %v456_v44 }
 0x10b   :  { %v419_v53 = vadd.f32 %v763_v26, %v418_v48  ;;  %v488_v54 = vadd.f32 %v487_v50, %v457_v49  ;;  %v462_v26 = vmul.f32 %v799_v37, %v799_v37 }
 0x10d   :  { %v489_v56 = vadd.f32 %v488_v54, %v458_v51  ;;  %v420_v58 = vadd.f32 %v781_v30, %v419_v53  ;;  %v463_v30 = vmul.f32 %v817_v47, %v817_v47 }
 0x10f   :  { %v421_v28 = vadd.f32 %v420_v58, %v808_v42  ;;  %v490_v60 = vadd.f32 %v489_v56, %v459_v55 }
 0x111   :  { %v491_v32 = vadd.f32 %v490_v60, %v460_v59  ;;  %v422_v61 = vadd.f32 %v421_v28, %v826_v52 }
 0x113   :  { %v423_v0 = vadd.f32 %v799_v37, %v422_v61  ;;  %v492_v1 = vadd.f32 %v491_v32, %v461_v63  ;;  %v466_v37 = vmul.f32 %v835_v57, %v835_v57 }
 0x115   :  { %v493_v2 = vadd.f32 %v492_v1, %v462_v26  ;;  %v424_v4 = vadd.f32 %v817_v47, %v423_v0  ;;  %v467_v47 = vmul.f32 %v853_v3, %v853_v3 }
 0x117   :  { %v425_v42 = vadd.f32 %v424_v4, %v844_v62  ;;  %v494_v6 = vadd.f32 %v493_v2, %v463_v30 }
 0x119   :  { %v495_v7 = vadd.f32 %v494_v6, %v464_v5  ;;  %v426_v52 = vadd.f32 %v425_v42, %v862_v8  ;;  %v470_v8 = vmul.f32 %v871_v13, %v871_v13 }
 0x11b   :  { %v427_v10 = vadd.f32 %v835_v57, %v426_v52  ;;  %v496_v11 = vadd.f32 %v495_v7, %v465_v9  ;;  %v471_v57 = vmul.f32 %v886_v23, %v886_v23 }
 0x11d   :  { %v497_v12 = vadd.f32 %v496_v11, %v466_v37  ;;  %v428_v14 = vadd.f32 %v853_v3, %v427_v10 }
 0x11f   :  { %v429_v62 = vadd.f32 %v428_v14, %v353_v18  ;;  %v498_v16 = vadd.f32 %v497_v12, %v467_v47 }
 0x121   :  { %v499_v17 = vadd.f32 %v498_v16, %v468_v15  ;;  %v430_v19 = vadd.f32 %v429_v62, %v356_v31 }
 0x123   :  { %v431_v21 = vadd.f32 %v871_v13, %v430_v19  ;;  %v500_v22 = vadd.f32 %v499_v17, %v469_v20 }
 0x125   :  { %v432_v24 = vadd.f32 %v886_v23, %v431_v21  ;;  %v501_v25 = vadd.f32 %v500_v22, %v470_v8 }
 0x127   :  { %v433_v27 = vrot.slane %v432_v24, 4  ;;  %v502_v3 = vadd.f32 %v501_v25, %v471_v57 }
 0x129   :  { %v434_v29 = vadd.f32 %v433_v27, %v432_v24  ;;  %v503_v18 = vrot.slane %v502_v3, 4 }
 0x12b   :  { %v435_v33 = vrot.slane %v434_v29, 2  ;;  %v504_v34 = vadd.f32 %v503_v18, %v502_v3 }
 0x12d   :  { %v436_v35 = vadd.f32 %v435_v33, %v434_v29  ;;  %v505_v31 = vrot.slane %v504_v34, 2 }
 0x12f   :  { %v437_v36 = vrot.slane %v436_v35, 1  ;;  %v506_v38 = vadd.f32 %v505_v31, %v504_v34 }
 0x131   :  { %v438_v39 = vadd.f32 %v437_v36, %v436_v35  ;;  %v507_v40 = vrot.slane %v506_v38, 1 }
 0x133   :  { %439 = vst [vmem:[%s951_s3] sm:$0x1] %v438_v39  ;;  %v508_v13 = vadd.f32 %v507_v40, %v506_v38 }
 0x135   :  { %509 = vst [vmem:[%s952_s4] sm:$0x1] %v508_v13 }

</bundles_post_ra>
